<compile_context>
chip_gen: v6e
topology: v6e:2x2x1
jax: 0.10.0
libtpu: 0.0.40
codegen_flags: <defaults>
</compile_context>

<pallas_src>
import functools

import jax
import jax.numpy as jnp
from jax.experimental import pallas as pl
from jax.experimental.pallas import tpu as pltpu


_PARAM_ORDER = ("w_enc1", "w_hh", "w_head", "w_d1z", "w_d1y", "w_out",
                "b_hid", "b_head", "b_out")


def _round_up(x, m):
    return ((x + m - 1) // m) * m


def _cvae_kernel(xy_ref, y_ref, eps_ref,
                 w_enc1_ref, w_hh_ref, w_head_ref, w_d1z_ref, w_d1y_ref, w_out_ref,
                 b_hid_ref, b_head_ref, b_out_ref,
                 out_ref, *, lat_pad, din_pad):
    """One batch tile of the full CVAE forward. All weights are VMEM-resident."""
    cdt = w_hh_ref.dtype          # MXU input dtype (f32, or bf16 on v6e/v7x)
    f32 = jnp.float32

    xy = xy_ref[...]              # [TB, Din+Dc]  (pre-concatenated in the wrapper)
    y = y_ref[...]                # [TB, Dc]
    eps = eps_ref[...].astype(f32)  # [TB, lat_pad] (zero-padded beyond latent_dim)

    def mm(a, w):                 # MXU matmul, f32 accumulation
        return jnp.dot(a.astype(cdt), w, preferred_element_type=f32)

    def bias(i):                  # row i of the packed [6, H] hidden-bias slab
        return b_hid_ref[pl.ds(i, 1), :].astype(f32)

    # ---- encoder: 3 hidden layers (ReLU) ----
    h = jnp.maximum(mm(xy, w_enc1_ref[...]) + bias(0), 0.0)
    h = jnp.maximum(mm(h, w_hh_ref[0]) + bias(1), 0.0)
    h = jnp.maximum(mm(h, w_hh_ref[1]) + bias(2), 0.0)

    # ---- fused mu|logvar head, padded to 2 x lat_pad lanes (vreg-aligned split) ----
    head = mm(h, w_head_ref[...]) + b_head_ref[...].astype(f32)   # [TB, 2*lat_pad]
    mu = head[:, :lat_pad]
    logvar = head[:, lat_pad:]

    # ---- reparameterize: z = mu + eps * exp(0.5 * logvar)  (f32 elementwise) ----
    # Padded lanes: mu = 0, eps = 0  ->  z = 0.
    z = mu + eps * jnp.exp(0.5 * logvar)

    # ---- decoder: Linear(cat([z, y])) as split matmul + 2 hidden + out + sigmoid ----
    g = jnp.maximum(mm(z, w_d1z_ref[...]) + mm(y, w_d1y_ref[...]) + bias(3), 0.0)
    g = jnp.maximum(mm(g, w_hh_ref[2]) + bias(4), 0.0)
    g = jnp.maximum(mm(g, w_hh_ref[3]) + bias(5), 0.0)
    recon = jax.nn.sigmoid(mm(g, w_out_ref[...]) + b_out_ref[...].astype(f32))  # [TB, din_pad]

    # Two lane-dense stores: [recon_pad | mu_pad | logvar_pad], every offset/width
    # a multiple of 128 -> unmasked vst, no in-kernel concatenate.
    out_ref[:, :din_pad] = recon.astype(out_ref.dtype)
    out_ref[:, din_pad:] = head.astype(out_ref.dtype)


def _resident_spec(arr):
    """Whole-array block with a constant index_map -> stays VMEM-resident across grid."""
    zeros = (0,) * arr.ndim
    return pl.BlockSpec(arr.shape, lambda i, _z=zeros: _z)


def _vmem_capacity_bytes():
    try:
        return int(getattr(pltpu.get_tpu_info(), "vmem_capacity_bytes", 64 << 20))
    except Exception:
        return 64 << 20


def _choose_tile(batch, block_batch):
    """Batch tile size. Default: 1 whole-batch tile if small, else 2 balanced
    128-aligned tiles (keeps both v7x TCs busy; single extra step on v5e/v6e)."""
    if block_batch is not None:
        tb = min(batch, int(block_batch))
        if tb < batch:
            tb = _round_up(tb, 128) if tb >= 128 else max(8, _round_up(tb, 8))
        return tb
    if batch <= 128:
        return batch                          # single full-extent tile
    return min(_round_up(pl.cdiv(batch, 2), 128), 1024)


def cvae_forward(x, y, eps, params, *, block_batch=None):
    """Full CVAE forward in one pallas_call, gridded (and pipelined) over the batch."""
    batch, input_dim = x.shape
    cond_dim = y.shape[1]
    latent_dim = eps.shape[1]
    hidden_dim = params["w_hh"].shape[-1]
    lat_pad = params["w_head"].shape[1] // 2       # padded latent lane width (>=128)
    din_pad = params["w_out"].shape[1]             # padded recon lane width  (>=128)
    enc_in = input_dim + cond_dim
    out_width = din_pad + 2 * lat_pad              # lane-dense output slab width

    tb = _choose_tile(batch, block_batch)
    grid = (pl.cdiv(batch, tb),)

    # Pre-concatenate the encoder input (folds the encoder split-matmul) and pad eps
    # to the padded latent width so the reparameterize stays vreg-aligned in-kernel.
    xy = jnp.concatenate([x, y], axis=-1)
    if latent_dim < lat_pad:
        eps = jnp.pad(eps, ((0, 0), (0, lat_pad - latent_dim)))
    # TODO(synk): generate eps in-kernel (pltpu.prng_seed + pltpu.prng_random_bits /
    # pltpu.stateful_normal) to drop this input DMA stream; kept as an input so the
    # run is deterministic vs the pure-JAX reference.

    param_list = [params[k] for k in _PARAM_ORDER]

    # VMEM budget: resident weights + double-buffered activation/output tiles + slack,
    # clamped generation-aware (physical VMEM minus ~16 MiB compiler headroom).
    # TODO(synk): for very large hidden_dim on v7x (f32 [4,H,H] slab ~> 48 MiB) the
    # w_hh slab should get a blocked BlockSpec over an "arbitrary" layer axis (or
    # bf16 params) instead of whole-array residency.
    param_bytes = sum(int(p.size) * p.dtype.itemsize for p in param_list)
    io_tile_bytes = 4 * tb * (enc_in + cond_dim + lat_pad + out_width)
    work_bytes = 8 * 4 * tb * max(hidden_dim, out_width)
    vmem_cap = _vmem_capacity_bytes()
    vmem_limit = param_bytes + 2 * io_tile_bytes + work_bytes + (8 << 20)
    vmem_limit = min(max(vmem_limit, 32 << 20), max(vmem_cap - (16 << 20), 32 << 20))

    flops = 2 * batch * (enc_in * hidden_dim
                         + 4 * hidden_dim * hidden_dim
                         + hidden_dim * 2 * lat_pad
                         + (lat_pad + cond_dim) * hidden_dim
                         + hidden_dim * din_pad)
    cost = pl.CostEstimate(
        flops=int(flops),
        transcendentals=int(batch * (lat_pad + din_pad)),
        bytes_accessed=int(param_bytes + io_tile_bytes * grid[0]),
    )

    kernel = functools.partial(_cvae_kernel, lat_pad=lat_pad, din_pad=din_pad)

    out = pl.pallas_call(
        kernel,
        out_shape=jax.ShapeDtypeStruct((batch, out_width), jnp.float32),
        grid=grid,
        in_specs=(
            [pl.BlockSpec((tb, enc_in), lambda i: (i, 0)),
             pl.BlockSpec((tb, cond_dim), lambda i: (i, 0)),
             pl.BlockSpec((tb, lat_pad), lambda i: (i, 0))]
            + [_resident_spec(p) for p in param_list]
        ),
        out_specs=pl.BlockSpec((tb, out_width), lambda i: (i, 0)),
        compiler_params=pltpu.CompilerParams(
            dimension_semantics=("parallel",),
            vmem_limit_bytes=int(vmem_limit),
        ),
        cost_estimate=cost,
    )(xy, y, eps, *param_list)

    recon = out[:, :input_dim]
    mu = out[:, din_pad:din_pad + latent_dim]
    logvar = out[:, din_pad + lat_pad:din_pad + lat_pad + latent_dim]
    return recon, mu, logvar


def init_params(key, input_dim, latent_dim, condition_dim, hidden_dim,
                dtype=jnp.float32):
    """PyTorch nn.Linear-style init (U(+/-1/sqrt(fan_in))), packed + lane-padded.

    Weights are [in, out]; the mu/logvar heads are fused and padded to 2 x lat_pad
    lanes, the recon head is padded to din_pad lanes, the 4 hidden x hidden weights
    and the 6 hidden-width biases are stacked into single slabs.
    """
    def lin(k, fan_in, fan_out):
        kw, kb = jax.random.split(k)
        bound = 1.0 / (float(fan_in) ** 0.5)
        w = jax.random.uniform(kw, (fan_in, fan_out), jnp.float32, -bound, bound)
        b = jax.random.uniform(kb, (fan_out,), jnp.float32, -bound, bound)
        return w, b

    lat_pad = max(128, _round_up(latent_dim, 128))
    din_pad = max(128, _round_up(input_dim, 128))

    keys = jax.random.split(key, 9)
    e1w, e1b = lin(keys[0], input_dim + condition_dim, hidden_dim)
    e2w, e2b = lin(keys[1], hidden_dim, hidden_dim)
    e3w, e3b = lin(keys[2], hidden_dim, hidden_dim)
    muw, mub = lin(keys[3], hidden_dim, latent_dim)
    lvw, lvb = lin(keys[4], hidden_dim, latent_dim)
    d1w, d1b = lin(keys[5], latent_dim + condition_dim, hidden_dim)
    d2w, d2b = lin(keys[6], hidden_dim, hidden_dim)
    d3w, d3b = lin(keys[7], hidden_dim, hidden_dim)
    d4w, d4b = lin(keys[8], hidden_dim, input_dim)

    w_head = (jnp.zeros((hidden_dim, 2 * lat_pad), jnp.float32)
              .at[:, :latent_dim].set(muw)
              .at[:, lat_pad:lat_pad + latent_dim].set(lvw))
    b_head = (jnp.zeros((1, 2 * lat_pad), jnp.float32)
              .at[0, :latent_dim].set(mub)
              .at[0, lat_pad:lat_pad + latent_dim].set(lvb))
    w_d1z = (jnp.zeros((lat_pad, hidden_dim), jnp.float32)
             .at[:latent_dim].set(d1w[:latent_dim]))
    w_out = jnp.zeros((hidden_dim, din_pad), jnp.float32).at[:, :input_dim].set(d4w)
    b_out = jnp.zeros((1, din_pad), jnp.float32).at[0, :input_dim].set(d4b)

    packed = {
        "w_enc1": e1w,                                      # [Din+Dc, H] encoder layer 1
        "w_hh": jnp.stack([e2w, e3w, d2w, d3w]),            # [4, H, H]
        "w_head": w_head,                                   # [H, 2*lat_pad] fused mu|logvar
        "w_d1z": w_d1z,                                     # [lat_pad, H] z-half of dec layer 1
        "w_d1y": d1w[latent_dim:],                          # [Dc, H]      y-half of dec layer 1
        "w_out": w_out,                                     # [H, din_pad]
        "b_hid": jnp.stack([e1b, e2b, e3b, d1b, d2b, d3b]), # [6, H]
        "b_head": b_head,                                   # [1, 2*lat_pad]
        "b_out": b_out,                                     # [1, din_pad]
    }
    return {k: v.astype(dtype) for k, v in packed.items()}


def cvae_forward_ref(x, y, eps, params):
    """Pure-JAX reference (same math as the kernel / the PyTorch module)."""
    p = {k: v.astype(jnp.float32) for k, v in params.items()}
    din = x.shape[1]
    dz = eps.shape[1]
    lat_pad = p["w_head"].shape[1] // 2
    xy = jnp.concatenate([x, y], axis=-1)
    h = jnp.maximum(xy @ p["w_enc1"] + p["b_hid"][0], 0.0)
    h = jnp.maximum(h @ p["w_hh"][0] + p["b_hid"][1], 0.0)
    h = jnp.maximum(h @ p["w_hh"][1] + p["b_hid"][2], 0.0)
    head = h @ p["w_head"] + p["b_head"]
    mu = head[:, :dz]
    logvar = head[:, lat_pad:lat_pad + dz]
    z = mu + eps * jnp.exp(0.5 * logvar)
    z_pad = jnp.pad(z, ((0, 0), (0, lat_pad - dz)))
    g = jnp.maximum(z_pad @ p["w_d1z"] + y @ p["w_d1y"] + p["b_hid"][3], 0.0)
    g = jnp.maximum(g @ p["w_hh"][2] + p["b_hid"][4], 0.0)
    g = jnp.maximum(g @ p["w_hh"][3] + p["b_hid"][5], 0.0)
    recon = jax.nn.sigmoid(g @ p["w_out"] + p["b_out"])[:, :din]
    return recon, mu, logvar


if __name__ == "__main__":
    input_dim, condition_dim, latent_dim, hidden_dim = 16, 4, 8, 32
    root = jax.random.PRNGKey(0)
    kp, kx, ky, ke, kx2, ky2, ke2 = jax.random.split(root, 7)

    params = init_params(kp, input_dim, latent_dim, condition_dim, hidden_dim)

    # --- small batch (single grid step), strict f32 check ---
    b = 8
    x = jax.random.normal(kx, (b, input_dim), jnp.float32)
    y = jax.random.normal(ky, (b, condition_dim), jnp.float32)
    # eps of torch.randn_like(std) is generated in the wrapper for determinism.
    eps = jax.random.normal(ke, (b, latent_dim), jnp.float32)
    recon, mu, logvar = jax.block_until_ready(cvae_forward(x, y, eps, params))
    r_ref, m_ref, l_ref = cvae_forward_ref(x, y, eps, params)
    assert jnp.allclose(recon, r_ref, atol=2e-5, rtol=2e-5)
    assert jnp.allclose(mu, m_ref, atol=2e-5, rtol=2e-5)
    assert jnp.allclose(logvar, l_ref, atol=2e-5, rtol=2e-5)

    # --- larger batch: two balanced 256-row tiles, grid=(2,), parallel across TCs ---
    b = 512
    x = jax.random.normal(kx2, (b, input_dim), jnp.float32)
    y = jax.random.normal(ky2, (b, condition_dim), jnp.float32)
    eps = jax.random.normal(ke2, (b, latent_dim), jnp.float32)
    recon, mu, logvar = jax.block_until_ready(cvae_forward(x, y, eps, params))
    r_ref, m_ref, l_ref = cvae_forward_ref(x, y, eps, params)
    assert jnp.allclose(recon, r_ref, atol=2e-5, rtol=2e-5)
    assert jnp.allclose(mu, m_ref, atol=2e-5, rtol=2e-5)
    assert jnp.allclose(logvar, l_ref, atol=2e-5, rtol=2e-5)

    # --- bf16 weights on the matmul path (v6e/v7x MXU-native), loose tolerance ---
    params_bf16 = init_params(kp, input_dim, latent_dim, condition_dim, hidden_dim,
                              dtype=jnp.bfloat16)
    recon, mu, logvar = jax.block_until_ready(cvae_forward(x, y, eps, params_bf16))
    r_ref, m_ref, l_ref = cvae_forward_ref(x, y, eps, params_bf16)
    assert jnp.allclose(recon, r_ref, atol=1e-1, rtol=1e-1)
    assert jnp.allclose(mu, m_ref, atol=1e-1, rtol=1e-1)
    assert jnp.allclose(logvar, l_ref, atol=1e-1, rtol=1e-1)

    print("KERNEL_OK")
</pallas_src>

<mosaic_0001>
module attributes {stable_mosaic.version = 11 : i64} {
  func.func @_cvae_kernel(%arg0: i32, %arg1: memref<8x20xf32, #tpu.memory_space<vmem>>, %arg2: memref<8x4xf32, #tpu.memory_space<vmem>>, %arg3: memref<8x128xf32, #tpu.memory_space<vmem>>, %arg4: memref<20x32xf32, #tpu.memory_space<vmem>>, %arg5: memref<4x32x32xf32, #tpu.memory_space<vmem>>, %arg6: memref<32x256xf32, #tpu.memory_space<vmem>>, %arg7: memref<128x32xf32, #tpu.memory_space<vmem>>, %arg8: memref<4x32xf32, #tpu.memory_space<vmem>>, %arg9: memref<32x128xf32, #tpu.memory_space<vmem>>, %arg10: memref<6x32xf32, #tpu.memory_space<vmem>>, %arg11: memref<1x256xf32, #tpu.memory_space<vmem>>, %arg12: memref<1x128xf32, #tpu.memory_space<vmem>>, %arg13: memref<8x384xf32, #tpu.memory_space<vmem>>) attributes {dimension_semantics = [#tpu.dimension_semantics<parallel>], iteration_bounds = array<i64: 1>, scalar_prefetch = 0 : i64, scratch_operands = 0 : i64, tpu.core_type = #tpu.core_type<tc>, window_params = [{transform_indices = @transform_0, window_bounds = array<i64: 8, 20>}, {transform_indices = @transform_1, window_bounds = array<i64: 8, 4>}, {transform_indices = @transform_2, window_bounds = array<i64: 8, 128>}, {pipeline_mode = #tpu.pipeline_mode<synchronous>, transform_indices = @transform_3, window_bounds = array<i64: 20, 32>}, {pipeline_mode = #tpu.pipeline_mode<synchronous>, transform_indices = @transform_4, window_bounds = array<i64: 4, 32, 32>}, {pipeline_mode = #tpu.pipeline_mode<synchronous>, transform_indices = @transform_5, window_bounds = array<i64: 32, 256>}, {pipeline_mode = #tpu.pipeline_mode<synchronous>, transform_indices = @transform_6, window_bounds = array<i64: 128, 32>}, {pipeline_mode = #tpu.pipeline_mode<synchronous>, transform_indices = @transform_7, window_bounds = array<i64: 4, 32>}, {pipeline_mode = #tpu.pipeline_mode<synchronous>, transform_indices = @transform_8, window_bounds = array<i64: 32, 128>}, {pipeline_mode = #tpu.pipeline_mode<synchronous>, transform_indices = @transform_9, window_bounds = array<i64: 6, 32>}, {pipeline_mode = #tpu.pipeline_mode<synchronous>, transform_indices = @transform_10, window_bounds = array<i64: 1, 256>}, {pipeline_mode = #tpu.pipeline_mode<synchronous>, transform_indices = @transform_11, window_bounds = array<i64: 1, 128>}, {transform_indices = @transform_12, window_bounds = array<i64: 8, 384>}]} {
    %c0 = arith.constant 0 : index
    %c0_0 = arith.constant 0 : index
    %0 = vector.load %arg1[%c0, %c0_0] : memref<8x20xf32, #tpu.memory_space<vmem>>, vector<8x20xf32>
    %c0_1 = arith.constant 0 : index
    %c0_2 = arith.constant 0 : index
    %1 = vector.load %arg2[%c0_1, %c0_2] : memref<8x4xf32, #tpu.memory_space<vmem>>, vector<8x4xf32>
    %c0_3 = arith.constant 0 : index
    %c0_4 = arith.constant 0 : index
    %2 = vector.load %arg3[%c0_3, %c0_4] : memref<8x128xf32, #tpu.memory_space<vmem>>, vector<8x128xf32>
    %c0_5 = arith.constant 0 : index
    %c0_6 = arith.constant 0 : index
    %3 = vector.load %arg4[%c0_5, %c0_6] : memref<20x32xf32, #tpu.memory_space<vmem>>, vector<20x32xf32>
    %cst = arith.constant dense<0.000000e+00> : vector<8x32xf32>
    %4 = tpu.matmul %0, %3, %cst {dimension_numbers = #tpu.dot_dimension_numbers<[1], [0], [0], [1], [0, 0, 1, 1], [], []>} : vector<8x20xf32>, vector<20x32xf32>, vector<8x32xf32> -> vector<8x32xf32>
    %c0_7 = arith.constant 0 : index
    %c0_8 = arith.constant 0 : index
    %5 = vector.load %arg10[%c0_7, %c0_8] : memref<6x32xf32, #tpu.memory_space<vmem>>, vector<1x32xf32>
    %6 = vector.broadcast %5 : vector<1x32xf32> to vector<8x32xf32>
    %7 = arith.addf %4, %6 : vector<8x32xf32>
    %cst_9 = arith.constant 0.000000e+00 : f32
    %8 = vector.broadcast %cst_9 : f32 to vector<8x32xf32>
    %9 = arith.maximumf %7, %8 : vector<8x32xf32>
    %c0_10 = arith.constant 0 : index
    %c0_11 = arith.constant 0 : index
    %c0_12 = arith.constant 0 : index
    %10 = vector.load %arg5[%c0_10, %c0_11, %c0_12] : memref<4x32x32xf32, #tpu.memory_space<vmem>>, vector<1x32x32xf32>
    %11 = vector.shape_cast %10 : vector<1x32x32xf32> to vector<32x32xf32>
    %cst_13 = arith.constant dense<0.000000e+00> : vector<8x32xf32>
    %12 = tpu.matmul %9, %11, %cst_13 {dimension_numbers = #tpu.dot_dimension_numbers<[1], [0], [0], [1], [0, 0, 1, 1], [], []>} : vector<8x32xf32>, vector<32x32xf32>, vector<8x32xf32> -> vector<8x32xf32>
    %c1 = arith.constant 1 : index
    %c0_14 = arith.constant 0 : index
    %13 = vector.load %arg10[%c1, %c0_14] : memref<6x32xf32, #tpu.memory_space<vmem>>, vector<1x32xf32>
    %14 = vector.broadcast %13 : vector<1x32xf32> to vector<8x32xf32>
    %15 = arith.addf %12, %14 : vector<8x32xf32>
    %cst_15 = arith.constant 0.000000e+00 : f32
    %16 = vector.broadcast %cst_15 : f32 to vector<8x32xf32>
    %17 = arith.maximumf %15, %16 : vector<8x32xf32>
    %c1_16 = arith.constant 1 : index
    %c0_17 = arith.constant 0 : index
    %c0_18 = arith.constant 0 : index
    %18 = vector.load %arg5[%c1_16, %c0_17, %c0_18] : memref<4x32x32xf32, #tpu.memory_space<vmem>>, vector<1x32x32xf32>
    %19 = vector.shape_cast %18 : vector<1x32x32xf32> to vector<32x32xf32>
    %cst_19 = arith.constant dense<0.000000e+00> : vector<8x32xf32>
    %20 = tpu.matmul %17, %19, %cst_19 {dimension_numbers = #tpu.dot_dimension_numbers<[1], [0], [0], [1], [0, 0, 1, 1], [], []>} : vector<8x32xf32>, vector<32x32xf32>, vector<8x32xf32> -> vector<8x32xf32>
    %c2 = arith.constant 2 : index
    %c0_20 = arith.constant 0 : index
    %21 = vector.load %arg10[%c2, %c0_20] : memref<6x32xf32, #tpu.memory_space<vmem>>, vector<1x32xf32>
    %22 = vector.broadcast %21 : vector<1x32xf32> to vector<8x32xf32>
    %23 = arith.addf %20, %22 : vector<8x32xf32>
    %cst_21 = arith.constant 0.000000e+00 : f32
    %24 = vector.broadcast %cst_21 : f32 to vector<8x32xf32>
    %25 = arith.maximumf %23, %24 : vector<8x32xf32>
    %c0_22 = arith.constant 0 : index
    %c0_23 = arith.constant 0 : index
    %26 = vector.load %arg6[%c0_22, %c0_23] : memref<32x256xf32, #tpu.memory_space<vmem>>, vector<32x256xf32>
    %cst_24 = arith.constant dense<0.000000e+00> : vector<8x256xf32>
    %27 = tpu.matmul %25, %26, %cst_24 {dimension_numbers = #tpu.dot_dimension_numbers<[1], [0], [0], [1], [0, 0, 1, 1], [], []>} : vector<8x32xf32>, vector<32x256xf32>, vector<8x256xf32> -> vector<8x256xf32>
    %c0_25 = arith.constant 0 : index
    %c0_26 = arith.constant 0 : index
    %28 = vector.load %arg11[%c0_25, %c0_26] : memref<1x256xf32, #tpu.memory_space<vmem>>, vector<1x256xf32>
    %29 = vector.broadcast %28 : vector<1x256xf32> to vector<8x256xf32>
    %30 = arith.addf %27, %29 : vector<8x256xf32>
    %31 = vector.extract_strided_slice %30 {offsets = [0, 0], sizes = [8, 128], strides = [1, 1]} : vector<8x256xf32> to vector<8x128xf32>
    %32 = vector.extract_strided_slice %30 {offsets = [0, 128], sizes = [8, 128], strides = [1, 1]} : vector<8x256xf32> to vector<8x128xf32>
    %cst_27 = arith.constant 5.000000e-01 : f32
    %33 = vector.broadcast %cst_27 : f32 to vector<8x128xf32>
    %34 = arith.mulf %33, %32 : vector<8x128xf32>
    %35 = math.exp %34 : vector<8x128xf32>
    %36 = arith.mulf %2, %35 : vector<8x128xf32>
    %37 = arith.addf %31, %36 : vector<8x128xf32>
    %c0_28 = arith.constant 0 : index
    %c0_29 = arith.constant 0 : index
    %38 = vector.load %arg7[%c0_28, %c0_29] : memref<128x32xf32, #tpu.memory_space<vmem>>, vector<128x32xf32>
    %cst_30 = arith.constant dense<0.000000e+00> : vector<8x32xf32>
    %39 = tpu.matmul %37, %38, %cst_30 {dimension_numbers = #tpu.dot_dimension_numbers<[1], [0], [0], [1], [0, 0, 1, 1], [], []>} : vector<8x128xf32>, vector<128x32xf32>, vector<8x32xf32> -> vector<8x32xf32>
    %c0_31 = arith.constant 0 : index
    %c0_32 = arith.constant 0 : index
    %40 = vector.load %arg8[%c0_31, %c0_32] : memref<4x32xf32, #tpu.memory_space<vmem>>, vector<4x32xf32>
    %cst_33 = arith.constant dense<0.000000e+00> : vector<8x32xf32>
    %41 = tpu.matmul %1, %40, %cst_33 {dimension_numbers = #tpu.dot_dimension_numbers<[1], [0], [0], [1], [0, 0, 1, 1], [], []>} : vector<8x4xf32>, vector<4x32xf32>, vector<8x32xf32> -> vector<8x32xf32>
    %42 = arith.addf %39, %41 : vector<8x32xf32>
    %c3 = arith.constant 3 : index
    %c0_34 = arith.constant 0 : index
    %43 = vector.load %arg10[%c3, %c0_34] : memref<6x32xf32, #tpu.memory_space<vmem>>, vector<1x32xf32>
    %44 = vector.broadcast %43 : vector<1x32xf32> to vector<8x32xf32>
    %45 = arith.addf %42, %44 : vector<8x32xf32>
    %cst_35 = arith.constant 0.000000e+00 : f32
    %46 = vector.broadcast %cst_35 : f32 to vector<8x32xf32>
    %47 = arith.maximumf %45, %46 : vector<8x32xf32>
    %c2_36 = arith.constant 2 : index
    %c0_37 = arith.constant 0 : index
    %c0_38 = arith.constant 0 : index
    %48 = vector.load %arg5[%c2_36, %c0_37, %c0_38] : memref<4x32x32xf32, #tpu.memory_space<vmem>>, vector<1x32x32xf32>
    %49 = vector.shape_cast %48 : vector<1x32x32xf32> to vector<32x32xf32>
    %cst_39 = arith.constant dense<0.000000e+00> : vector<8x32xf32>
    %50 = tpu.matmul %47, %49, %cst_39 {dimension_numbers = #tpu.dot_dimension_numbers<[1], [0], [0], [1], [0, 0, 1, 1], [], []>} : vector<8x32xf32>, vector<32x32xf32>, vector<8x32xf32> -> vector<8x32xf32>
    %c4 = arith.constant 4 : index
    %c0_40 = arith.constant 0 : index
    %51 = vector.load %arg10[%c4, %c0_40] : memref<6x32xf32, #tpu.memory_space<vmem>>, vector<1x32xf32>
    %52 = vector.broadcast %51 : vector<1x32xf32> to vector<8x32xf32>
    %53 = arith.addf %50, %52 : vector<8x32xf32>
    %cst_41 = arith.constant 0.000000e+00 : f32
    %54 = vector.broadcast %cst_41 : f32 to vector<8x32xf32>
    %55 = arith.maximumf %53, %54 : vector<8x32xf32>
    %c3_42 = arith.constant 3 : index
    %c0_43 = arith.constant 0 : index
    %c0_44 = arith.constant 0 : index
    %56 = vector.load %arg5[%c3_42, %c0_43, %c0_44] : memref<4x32x32xf32, #tpu.memory_space<vmem>>, vector<1x32x32xf32>
    %57 = vector.shape_cast %56 : vector<1x32x32xf32> to vector<32x32xf32>
    %cst_45 = arith.constant dense<0.000000e+00> : vector<8x32xf32>
    %58 = tpu.matmul %55, %57, %cst_45 {dimension_numbers = #tpu.dot_dimension_numbers<[1], [0], [0], [1], [0, 0, 1, 1], [], []>} : vector<8x32xf32>, vector<32x32xf32>, vector<8x32xf32> -> vector<8x32xf32>
    %c5 = arith.constant 5 : index
    %c0_46 = arith.constant 0 : index
    %59 = vector.load %arg10[%c5, %c0_46] : memref<6x32xf32, #tpu.memory_space<vmem>>, vector<1x32xf32>
    %60 = vector.broadcast %59 : vector<1x32xf32> to vector<8x32xf32>
    %61 = arith.addf %58, %60 : vector<8x32xf32>
    %cst_47 = arith.constant 0.000000e+00 : f32
    %62 = vector.broadcast %cst_47 : f32 to vector<8x32xf32>
    %63 = arith.maximumf %61, %62 : vector<8x32xf32>
    %c0_48 = arith.constant 0 : index
    %c0_49 = arith.constant 0 : index
    %64 = vector.load %arg9[%c0_48, %c0_49] : memref<32x128xf32, #tpu.memory_space<vmem>>, vector<32x128xf32>
    %cst_50 = arith.constant dense<0.000000e+00> : vector<8x128xf32>
    %65 = tpu.matmul %63, %64, %cst_50 {dimension_numbers = #tpu.dot_dimension_numbers<[1], [0], [0], [1], [0, 0, 1, 1], [], []>} : vector<8x32xf32>, vector<32x128xf32>, vector<8x128xf32> -> vector<8x128xf32>
    %c0_51 = arith.constant 0 : index
    %c0_52 = arith.constant 0 : index
    %66 = vector.load %arg12[%c0_51, %c0_52] : memref<1x128xf32, #tpu.memory_space<vmem>>, vector<1x128xf32>
    %67 = vector.broadcast %66 : vector<1x128xf32> to vector<8x128xf32>
    %68 = arith.addf %65, %67 : vector<8x128xf32>
    %69 = arith.negf %68 : vector<8x128xf32>
    %70 = math.exp %69 : vector<8x128xf32>
    %cst_53 = arith.constant 1.000000e+00 : f32
    %71 = vector.broadcast %cst_53 : f32 to vector<8x128xf32>
    %72 = arith.addf %71, %70 : vector<8x128xf32>
    %73 = arith.divf %71, %72 : vector<8x128xf32>
    %c0_54 = arith.constant 0 : index
    %c0_55 = arith.constant 0 : index
    %74 = vector.load %arg13[%c0_54, %c0_55] : memref<8x384xf32, #tpu.memory_space<vmem>>, vector<8x128xf32>
    tpu.vector_store %arg13[%c0_54, %c0_55], %73 {strides = array<i32>} : memref<8x384xf32, #tpu.memory_space<vmem>>, vector<8x128xf32>,
    %c0_56 = arith.constant 0 : index
    %c128 = arith.constant 128 : index
    %75 = vector.load %arg13[%c0_56, %c128] : memref<8x384xf32, #tpu.memory_space<vmem>>, vector<8x256xf32>
    tpu.vector_store %arg13[%c0_56, %c128], %30 {strides = array<i32>} : memref<8x384xf32, #tpu.memory_space<vmem>>, vector<8x256xf32>,
    return
  }
  func.func @transform_0(%arg0: i32) -> (i32, i32) {
    %c0_i32 = arith.constant 0 : i32
    %c0_i32_0 = arith.constant 0 : i32
    return %arg0, %c0_i32 : i32, i32
  }
  func.func @transform_1(%arg0: i32) -> (i32, i32) {
    %c0_i32 = arith.constant 0 : i32
    %c0_i32_0 = arith.constant 0 : i32
    return %arg0, %c0_i32 : i32, i32
  }
  func.func @transform_2(%arg0: i32) -> (i32, i32) {
    %c0_i32 = arith.constant 0 : i32
    %c0_i32_0 = arith.constant 0 : i32
    return %arg0, %c0_i32 : i32, i32
  }
  func.func @transform_3(%arg0: i32) -> (i32, i32) {
    %c0_i32 = arith.constant 0 : i32
    %c0_i32_0 = arith.constant 0 : i32
    %c0_i32_1 = arith.constant 0 : i32
    return %c0_i32, %c0_i32_0 : i32, i32
  }
  func.func @transform_4(%arg0: i32) -> (i32, i32, i32) {
    %c0_i32 = arith.constant 0 : i32
    %c0_i32_0 = arith.constant 0 : i32
    %c0_i32_1 = arith.constant 0 : i32
    %c0_i32_2 = arith.constant 0 : i32
    return %c0_i32, %c0_i32_0, %c0_i32_1 : i32, i32, i32
  }
  func.func @transform_5(%arg0: i32) -> (i32, i32) {
    %c0_i32 = arith.constant 0 : i32
    %c0_i32_0 = arith.constant 0 : i32
    %c0_i32_1 = arith.constant 0 : i32
    return %c0_i32, %c0_i32_0 : i32, i32
  }
  func.func @transform_6(%arg0: i32) -> (i32, i32) {
    %c0_i32 = arith.constant 0 : i32
    %c0_i32_0 = arith.constant 0 : i32
    %c0_i32_1 = arith.constant 0 : i32
    return %c0_i32, %c0_i32_0 : i32, i32
  }
  func.func @transform_7(%arg0: i32) -> (i32, i32) {
    %c0_i32 = arith.constant 0 : i32
    %c0_i32_0 = arith.constant 0 : i32
    %c0_i32_1 = arith.constant 0 : i32
    return %c0_i32, %c0_i32_0 : i32, i32
  }
  func.func @transform_8(%arg0: i32) -> (i32, i32) {
    %c0_i32 = arith.constant 0 : i32
    %c0_i32_0 = arith.constant 0 : i32
    %c0_i32_1 = arith.constant 0 : i32
    return %c0_i32, %c0_i32_0 : i32, i32
  }
  func.func @transform_9(%arg0: i32) -> (i32, i32) {
    %c0_i32 = arith.constant 0 : i32
    %c0_i32_0 = arith.constant 0 : i32
    %c0_i32_1 = arith.constant 0 : i32
    return %c0_i32, %c0_i32_0 : i32, i32
  }
  func.func @transform_10(%arg0: i32) -> (i32, i32) {
    %c0_i32 = arith.constant 0 : i32
    %c0_i32_0 = arith.constant 0 : i32
    %c0_i32_1 = arith.constant 0 : i32
    return %c0_i32, %c0_i32_0 : i32, i32
  }
  func.func @transform_11(%arg0: i32) -> (i32, i32) {
    %c0_i32 = arith.constant 0 : i32
    %c0_i32_0 = arith.constant 0 : i32
    %c0_i32_1 = arith.constant 0 : i32
    return %c0_i32, %c0_i32_0 : i32, i32
  }
  func.func @transform_12(%arg0: i32) -> (i32, i32) {
    %c0_i32 = arith.constant 0 : i32
    %c0_i32_0 = arith.constant 0 : i32
    return %arg0, %c0_i32 : i32, i32
  }
}

</mosaic_0001>

<bundles_post_ra>
// kernel: tpu_custom_call.1
= control target key start
LH: loop header
LB: loop body
LE: loop exit
PB: predicated region body
PF: predicated region fallthrough
CT: control target
= control target key end

     0   :  { %17 = vsyncpa [#allocation3], 0  ;;  %s1463_s0 = inlined_call_operand.vmem [shape: f32[8,20], index: 0, kind: input, shape index: {}]   ;;  %s1464_s1 = inlined_call_operand.vmem [shape: f32[8,4], index: 1, kind: input, shape index: {}]   ;;  %s1465_s2 = inlined_call_operand.vmem [shape: f32[8,128], index: 2, kind: input, shape index: {}]   ;;  %s1466_s3 = inlined_call_operand.hbm [shape: f32[20,32], index: 3, kind: input, shape index: {}]   ;;  %s1467_s4 = inlined_call_operand.vmem [shape: f32[4,32,32], index: 4, kind: input, shape index: {}]   ;;  %s1468_s5 = inlined_call_operand.hbm [shape: f32[32,256], index: 5, kind: input, shape index: {}]   ;;  %s1469_s6 = inlined_call_operand.vmem [shape: f32[128,32], index: 6, kind: input, shape index: {}]   ;;  %s1470_s7 = inlined_call_operand.hbm [shape: f32[4,32], index: 7, kind: input, shape index: {}]   ;;  %s1471_s8 = inlined_call_operand.vmem [shape: f32[32,128], index: 8, kind: input, shape index: {}]   ;;  %s1472_s9 = inlined_call_operand.vmem [shape: f32[6,32], index: 9, kind: input, shape index: {}]   ;;  %s1473_s10 = inlined_call_operand.vmem [shape: f32[1,256], index: 10, kind: input, shape index: {}]   ;;  %s1474_s11 = inlined_call_operand.vmem [shape: f32[1,128], index: 11, kind: input, shape index: {}]   ;;  %s1475_s12 = inlined_call_operand.hbm [shape: f32[8,384], index: 12, kind: output, shape index: {}]  }
   0x1   :  { %18 = vsyncpa [#allocation6], 0 }
   0x2   :  { %19 = vsyncpa [#allocation4], 0  ;;  %s1170_s21 = smov [#allocation5]  }
   0x3   :  { %s45_s22 = sshll.u32 %s1170_s21, 4  ;;  %s46_s22 = int_to_ptr.vmem [resolvable:$true] %s45_s22 }
   0x4   :  { %s1092_s23 = scalar_lea.vmem %s46_s22, 1024  ;;  %p1097_p1 = scmp.lt.s32.totalorder %s46_s22, %s46_s22 }
   0x5   :  { %p1093_p0 = scmp.ne.s32.totalorder %s46_s22, %s1092_s23  ;;  %p1098_p2 = scmp.lt.s32.totalorder %s1092_s23, %s1092_s23 }
   0x7   :  { %p1099_p3 = por %p1098_p2, %p1097_p1 }
   0x9   :  { %p1100_p4 = pnand %p1099_p3, %p1093_p0 }
   0xb   :  { %1103 = shalt.err (!%p1100_p4)
}
   0xc   :  { %s1171_s24 = smov 256   ;;  %s1172_s25 = smov 16  }
   0xd   :  { %51 = dma.hbm_to_vmem [thread:$0]  %s1468_s5, 1024, %s46_s22, [#allocation6], %s1171_s24, %s1171_s24, %s1172_s25  }
   0xe   :  { %s1173_s28 = smov [#allocation2]  }
   0xf   :  { %s31_s29 = sshll.u32 %s1173_s28, 4  ;;  %s32_s29 = int_to_ptr.vmem [resolvable:$true] %s31_s29 }
  0x10   :  { %s1112_s30 = scalar_lea.vmem %s32_s29, 384  ;;  %p1117_p6 = scmp.lt.s32.totalorder %s32_s29, %s32_s29 }
  0x11   :  { %p1113_p5 = scmp.ne.s32.totalorder %s32_s29, %s1112_s30  ;;  %p1118_p7 = scmp.lt.s32.totalorder %s1112_s30, %s1112_s30 }
  0x13   :  { %p1119_p8 = por %p1118_p7, %p1117_p6 }
  0x15   :  { %p1120_p9 = pnand %p1119_p8, %p1113_p5 }
  0x17   :  { %1123 = shalt.err (!%p1120_p9)
}
  0x18   :  { %s1174_s13 = smov 128   ;;  %s1175_s14 = smov 8  }
  0x19   :  { %37 = dma.hbm_to_vmem [thread:$0]  %s1466_s3, 384, %s32_s29, [#allocation3], %s1174_s13, %s1174_s13, %s1175_s14  }
  0x1a   :  { %s1176_s17 = smov [#allocation7]  }
  0x1b   :  { %s60_s18 = sshll.u32 %s1176_s17, 4  ;;  %s61_s18 = int_to_ptr.vmem [resolvable:$true] %s60_s18 }
  0x1c   :  { %s1132_s5 = scalar_lea.vmem %s61_s18, 64  ;;  %p1137_p11 = scmp.lt.s32.totalorder %s61_s18, %s61_s18 }
  0x1d   :  { %p1133_p10 = scmp.ne.s32.totalorder %s61_s18, %s1132_s5  ;;  %p1138_p12 = scmp.lt.s32.totalorder %s1132_s5, %s1132_s5 }
  0x1f   :  { %p1139_p13 = por %p1138_p12, %p1137_p11 }
  0x21   :  { %p1140_p0 = pnand %p1139_p13, %p1133_p10 }
  0x23   :  { %1143 = shalt.err (!%p1140_p0)
}
  0x24   :  { %63 = dma.hbm_to_vmem [thread:$0]  %s1470_s7, 64, %s61_s18, [#allocation6]  }
  0x25   :  { %1164 = dma.done.wait [#allocation3], 384  }
  0x26   :  { %1165 = vsyncadd [#allocation3], 4294966912 }
  0x27   :  { %1166 = dma.done.wait [#allocation6], 1088  }
  0x28   :  { %1167 = vsyncadd [#allocation6], 4294966208  ;;  %v1177_v0 = vmov 0.0   ;;  %vm1178_vm0 = vmmov 0   ;;  %vm96_vm1 = vcmask 1043456   ;;  %v85_v2 = vld [vmem:[#allocation2 + $0x8] sm:$0xff]  ;;  %v349_v54 = vlaneseq }
  0x29   :  { %964 = vmatprep.subr.mxu0 %v1177_v0  ;;  %970 = vmatprep.mubr.msk.f32.mxu0 %vm1178_vm0, %v1177_v0  ;;  %v86_v1 = vld [vmem:[#allocation2 + $0x10] sm:$0xf]  ;;  %v174_v3 = vld [vmem:[%s1467_s4 + $0x18] sm:$0xff]  ;;  %v84_v4 = vld [vmem:[#allocation2] sm:$0xff]  ;;  %vm92_vm2 = vcmask 162816   ;;  %vm180_vm3 = vcmask 261120  }
  0x2a   :  { %973 = vmatprep.subr.mxu1 %v1177_v0  ;;  %981 = vmatprep.mubr.msk.f32.mxu1 %vm1178_vm0, %v1177_v0  ;;  %v81_v5 = vld [vmem:[%s1463_s0] sm:$0xff]  ;;  %v173_v6 = vld [vmem:[%s1467_s4 + $0x10] sm:$0xff]  ;;  %v172_v7 = vld [vmem:[%s1467_s4 + $0x8] sm:$0xff]  ;;  %vm455_vm4 = vcmask 31744   ;;  %v350_v55 = vshrl.u32 %v349_v54, 7 }
  0x2b   :  { %965 = vmatpush3.msk.msra.mxu0 %vm96_vm1, %v86_v1  ;;  %974 = vmatpush3.msra.mxu1 %v174_v3  ;;  %v171_v8 = vld [vmem:[%s1467_s4] sm:$0xff]  ;;  %v894_v9 = vld [vmem:[%s1467_s4 + $0x38] sm:$0xff]  ;;  %v893_v15 = vld [vmem:[%s1467_s4 + $0x30] sm:$0xff] }
  0x2c   :  { %966 = vmatprep.subr.mxu0 %v1177_v0  ;;  %975 = vmatprep.subr.mxu1 %v1177_v0  ;;  %v886_v10 = vld [vmem:[%s1472_s9] ss:$0 sm:$0xff]  ;;  %v892_v16 = vld [vmem:[%s1467_s4 + $0x28] sm:$0xff]  ;;  %v346_v18 = vld [vmem:[#allocation5 + $0x38] sm:$0xff]  ;;  %v351_v56 = vsub.s32 0, %v350_v55  ;;  %v355_v58 = vsub.s32 1, %v350_v55 }
  0x2d   :  { %967 = vmatpush3.msra.mxu0 %v85_v2  ;;  %976 = vmatpush3.msra.mxu1 %v173_v6  ;;  %v891_v17 = vld [vmem:[%s1467_s4 + $0x20] sm:$0xff]  ;;  %v345_v19 = vld [vmem:[#allocation5 + $0x30] sm:$0xff]  ;;  %v343_v26 = vld [vmem:[#allocation5 + $0x20] sm:$0xff] }
  0x2e   :  { %968 = vmatprep.subr.mxu0 %v1177_v0  ;;  %977 = vmatprep.subr.mxu1 %v1177_v0  ;;  %v344_v20 = vld [vmem:[#allocation5 + $0x28] sm:$0xff]  ;;  %v342_v27 = vld [vmem:[#allocation5 + $0x18] sm:$0xff]  ;;  %v341_v28 = vld [vmem:[#allocation5 + $0x10] sm:$0xff] }
  0x2f   :  { %969 = vmatpush3.msra.mxu0 %v84_v4  ;;  %978 = vmatpush3.msra.mxu1 %v172_v7  ;;  %v889_v21 = vld [vmem:[%s1472_s9 + $0x1] ss:$0 sm:$0xff]  ;;  %v339_v30 = vld [vmem:[#allocation5] sm:$0xff]  ;;  %v895_v31 = vld [vmem:[%s1472_s9 + $0x2] ss:$0 sm:$0xff] }
  0x30   :  { %971 = vmatmul.mubr.msk.f32.vlgmr.msra.gmra.mxu0 %vm92_vm2, %v81_v5  ;;  %984 = vmatprep.subr.mxu0 %v1177_v0  ;;  %v340_v29 = vld [vmem:[#allocation5 + $0x8] sm:$0xff]  ;;  %v453_v36 = vld [vmem:[%s1469_s6 + $0x78] sm:$0xff]  ;;  %v452_v37 = vld [vmem:[%s1469_s6 + $0x70] sm:$0xff] }
  0x31   :  { %992 = vmatprep.mubr.msk.f32.mxu0 %vm1178_vm0, %v1177_v0  ;;  %979 = vmatprep.subr.mxu1 %v1177_v0  ;;  %v451_v38 = vld [vmem:[%s1469_s6 + $0x68] sm:$0xff]  ;;  %v450_v39 = vld [vmem:[%s1469_s6 + $0x60] sm:$0xff]  ;;  %v449_v40 = vld [vmem:[%s1469_s6 + $0x58] sm:$0xff] }
  0x32   :  { %980 = vmatpush3.msra.mxu1 %v171_v8  ;;  %985 = vmatpush3.msra.mxu0 %v894_v9  ;;  %v448_v41 = vld [vmem:[%s1469_s6 + $0x50] sm:$0xff]  ;;  %v447_v42 = vld [vmem:[%s1469_s6 + $0x48] sm:$0xff]  ;;  %v446_v43 = vld [vmem:[%s1469_s6 + $0x40] sm:$0xff] }
  0x33   :  { %986 = vmatprep.subr.mxu0 %v1177_v0  ;;  %386 = vmatprep.subr.mxu1 %v346_v18  ;;  %v445_v44 = vld [vmem:[%s1469_s6 + $0x38] sm:$0xff]  ;;  %v444_v45 = vld [vmem:[%s1469_s6 + $0x30] sm:$0xff]  ;;  %v82_v47 = vld [vmem:[%s1464_s1] sm:$0xff] }
  0x34   :  { %987 = vmatpush3.msra.mxu0 %v893_v15  ;;  %v454_v46 = vld [vmem:[#allocation7] sm:$0xf]  ;;  %v443_v48 = vld [vmem:[%s1469_s6 + $0x28] sm:$0xff]  ;;  %v442_v49 = vld [vmem:[%s1469_s6 + $0x20] sm:$0xff] }
  0x35   :  { %988 = vmatprep.subr.mxu0 %v1177_v0  ;;  %v441_v50 = vld [vmem:[%s1469_s6 + $0x18] sm:$0xff]  ;;  %v440_v51 = vld [vmem:[%s1469_s6 + $0x10] sm:$0xff]  ;;  %v439_v52 = vld [vmem:[%s1469_s6 + $0x8] sm:$0xff] }
  0x36   :  { %989 = vmatpush3.msra.mxu0 %v892_v16  ;;  %v438_v53 = vld [vmem:[%s1469_s6] sm:$0xff] }
  0x37   :  { %990 = vmatprep.subr.mxu0 %v1177_v0  ;;  %v347_v57 = vld [vmem:[%s1473_s10] sm:$0x3]  ;;  %v900_v15 = vld [vmem:[%s1472_s9 + $0x3] ss:$0 sm:$0xff] }
  0x38   :  { %991 = vmatpush3.msra.mxu0 %v891_v17  ;;  %v352_v59 = vrot.slane %v347_v57, %v351_v56  ;;  %v356_v60 = vrot.slane %v347_v57, %v355_v58  ;;  %v83_v4 = vld [vmem:[%s1465_s2] sm:$0xff] }
  0x39   :  { %995 = vmatprep.subr.mxu0 %v1177_v0 }
  0xf0   :  { %v166_v11 = vpop.f32.mrf.mxu0 }
  0xf1   :  { %v167_v12 = vadd.f32 %v886_v10, %v166_v11  ;;  %v904_v10 = vld [vmem:[%s1467_s4 + $0x58] sm:$0xff]  ;;  %v903_v11 = vld [vmem:[%s1467_s4 + $0x50] sm:$0xff] }
  0xf2   :  { %v972_v13 = vpop.f32.mrf.mxu0 }
  0xf3   :  { %v170_v14 = vmax.f32 %v167_v12, 0.0  ;;  %v902_v12 = vld [vmem:[%s1467_s4 + $0x48] sm:$0xff]  ;;  %v901_v13 = vld [vmem:[%s1467_s4 + $0x40] sm:$0xff] }
  0xf5   :  { %982 = vmatmul.mubr.msk.f32.vlgmr.msra.gmra.mxu1 %vm180_vm3, %v170_v14 }
  0xf6   :  { %426 = vmatprep.mubr.f32.mxu1 %v1177_v0  ;;  %387 = vmatpush1.msra.mxu1 %v345_v19 }
  0xf7   :  { %388 = vmatprep.subr.mxu1 %v344_v20  ;;  %v910_v20 = vld [vmem:[%s1467_s4 + $0x78] sm:$0xff] }
  0xf8   :  { %389 = vmatpush1.msra.mxu1 %v343_v26 }
  0xf9   :  { %390 = vmatprep.subr.mxu1 %v342_v27 }
  0xfa   :  { %391 = vmatpush1.msra.mxu1 %v341_v28 }
  0xfb   :  { %392 = vmatprep.subr.mxu1 %v340_v29  ;;  %v780_v29 = vld [vmem:[%s1471_s8 + $0x18] sm:$0xff] }
  0xfc   :  { %393 = vmatpush1.msra.mxu1 %v339_v30  ;;  %v779_v30 = vld [vmem:[%s1471_s8 + $0x10] sm:$0xff] }
  0xfd   :  { %1000 = vmatprep.subr.mxu1 %v1177_v0 }
 0x1b5   :  { %v250_v22 = vpop.f32.mrf.mxu1 }
 0x1b6   :  { %v251_v23 = vadd.f32 %v889_v21, %v250_v22  ;;  %v909_v21 = vld [vmem:[%s1467_s4 + $0x70] sm:$0xff]  ;;  %v908_v22 = vld [vmem:[%s1467_s4 + $0x68] sm:$0xff] }
 0x1b7   :  { %v983_v24 = vpop.f32.mrf.mxu1 }
 0x1b8   :  { %v254_v25 = vmax.f32 %v251_v23, 0.0  ;;  %v907_v23 = vld [vmem:[%s1467_s4 + $0x60] sm:$0xff] }
 0x1b9   :  { %v905_v24 = vld [vmem:[%s1472_s9 + $0x4] ss:$0 sm:$0xff] }
 0x1ba   :  { %993 = vmatmul.mubr.msk.f32.vlgmr.msra.gmra.mxu0 %vm180_vm3, %v254_v25 }
 0x1bb   :  { %997 = vmatprep.mubr.msk.f32.mxu0 %vm1178_vm0, %v1177_v0  ;;  %996 = vmatpush3.msk.msra.mxu0 %vm96_vm1, %v454_v46 }
 0x1bc   :  { %1035 = vmatprep.subr.mxu0 %v1177_v0 }
 0x1be   :  { %998 = vmatmul.mubr.msk.f32.vlgmr.msra.gmra.mxu0 %vm455_vm4, %v82_v47 }
 0x1bf   :  { %1043 = vmatprep.mubr.msk.f32.mxu0 %vm1178_vm0, %v1177_v0  ;;  %1036 = vmatpush3.msra.mxu0 %v904_v10 }
 0x1c0   :  { %1037 = vmatprep.subr.mxu0 %v1177_v0 }
 0x1c1   :  { %1038 = vmatpush3.msra.mxu0 %v903_v11 }
 0x1c2   :  { %1039 = vmatprep.subr.mxu0 %v1177_v0 }
 0x1c3   :  { %1040 = vmatpush3.msra.mxu0 %v902_v12 }
 0x1c4   :  { %1041 = vmatprep.subr.mxu0 %v1177_v0 }
 0x1c5   :  { %1042 = vmatpush3.msra.mxu0 %v901_v13 }
 0x1c6   :  { %1046 = vmatprep.subr.mxu0 %v1177_v0 }
 0x27a   :  { %v334_v32 = vpop.f32.mrf.mxu0 }
 0x27b   :  { %v335_v33 = vadd.f32 %v895_v31, %v334_v32  ;;  %v778_v31 = vld [vmem:[%s1471_s8 + $0x8] sm:$0xff]  ;;  %v777_v32 = vld [vmem:[%s1471_s8] sm:$0xff]  ;;  %s1179_s8 = smov [#allocation8]  }
 0x27c   :  { %v994_v34 = vpop.f32.mrf.mxu0 }
 0x27d   :  { %v338_v35 = vmax.f32 %v335_v33, 0.0  ;;  %v911_v33 = vld [vmem:[%s1472_s9 + $0x5] ss:$0 sm:$0xff]  ;;  %s876_s9 = sshll.u32 %s1179_s8, 4  ;;  %s877_s9 = int_to_ptr.vmem [resolvable:$true] %s876_s9 }
 0x27e   :  { %v528_v8 = vpop.f32.mrf.mxu0  ;;  %s1144_s5 = scalar_lea.vmem %s877_s9, 384  ;;  %p1149_p2 = scmp.lt.s32.totalorder %s877_s9, %s877_s9 }
 0x27f   :  { %897 = vmatmul.mubr.msk.f32.vlgmr.msra.gmra.mxu1 %vm180_vm3, %v338_v35  ;;  %p1145_p1 = scmp.ne.s32.totalorder %s877_s9, %s1144_s5  ;;  %p1150_p3 = scmp.lt.s32.totalorder %s1144_s5, %s1144_s5 }
 0x280   :  { %1001 = vmatpush3.msra.mxu1 %v453_v36  ;;  %1032 = vmatprep.mubr.msk.f32.mxu1 %vm1178_vm0, %v1177_v0  ;;  %v999_v9 = vpop.f32.mrf.mxu0 }
 0x281   :  { %1002 = vmatprep.subr.mxu1 %v1177_v0  ;;  %p1151_p4 = por %p1150_p3, %p1149_p2 }
 0x282   :  { %1003 = vmatpush3.msra.mxu1 %v452_v37 }
 0x283   :  { %1004 = vmatprep.subr.mxu1 %v1177_v0  ;;  %p1152_p5 = pnand %p1151_p4, %p1145_p1 }
 0x284   :  { %1005 = vmatpush3.msra.mxu1 %v451_v38  ;;  %v913_v38 = vld [vmem:[%s1474_s11] ss:$0 sm:$0xff] }
 0x285   :  { %1006 = vmatprep.subr.mxu1 %v1177_v0 }
 0x286   :  { %1007 = vmatpush3.msra.mxu1 %v450_v39 }
 0x287   :  { %1008 = vmatprep.subr.mxu1 %v1177_v0 }
 0x288   :  { %1009 = vmatpush3.msra.mxu1 %v449_v40 }
 0x289   :  { %1010 = vmatprep.subr.mxu1 %v1177_v0 }
 0x28a   :  { %1011 = vmatpush3.msra.mxu1 %v448_v41 }
 0x28b   :  { %1012 = vmatprep.subr.mxu1 %v1177_v0 }
 0x28c   :  { %1013 = vmatpush3.msra.mxu1 %v447_v42 }
 0x28d   :  { %1014 = vmatprep.subr.mxu1 %v1177_v0 }
 0x28e   :  { %1015 = vmatpush3.msra.mxu1 %v446_v43 }
 0x28f   :  { %1016 = vmatprep.subr.mxu1 %v1177_v0 }
 0x290   :  { %1017 = vmatpush3.msra.mxu1 %v445_v44 }
 0x291   :  { %1018 = vmatprep.subr.mxu1 %v1177_v0 }
 0x292   :  { %1019 = vmatpush3.msra.mxu1 %v444_v45 }
 0x293   :  { %1020 = vmatprep.subr.mxu1 %v1177_v0 }
 0x294   :  { %1021 = vmatpush3.msra.mxu1 %v443_v48 }
 0x295   :  { %1022 = vmatprep.subr.mxu1 %v1177_v0 }
 0x296   :  { %1023 = vmatpush3.msra.mxu1 %v442_v49 }
 0x297   :  { %1024 = vmatprep.subr.mxu1 %v1177_v0 }
 0x298   :  { %1025 = vmatpush3.msra.mxu1 %v441_v50 }
 0x299   :  { %1026 = vmatprep.subr.mxu1 %v1177_v0 }
 0x29a   :  { %1027 = vmatpush3.msra.mxu1 %v440_v51 }
 0x29b   :  { %1028 = vmatprep.subr.mxu1 %v1177_v0 }
 0x29c   :  { %1029 = vmatpush3.msra.mxu1 %v439_v52 }
 0x29d   :  { %1030 = vmatprep.subr.mxu1 %v1177_v0 }
 0x29e   :  { %1031 = vmatpush3.msra.mxu1 %v438_v53 }
 0x33f   :  { %v428_v61 = vpop.f32.mrf.mxu1 }
 0x340   :  { %v429_v62 = vadd.f32 %v428_v61, %v352_v59 }
 0x341   :  { %v430_v63 = vpop.f32.mrf.mxu1 }
 0x342   :  { %868 = vst [vmem:[#allocation8 + $0x8] sm:$0xff] %v429_v62  ;;  %v431_v1 = vadd.f32 %v430_v63, %v356_v60 }
 0x344   :  { %v433_v2 = vmul.f32 0.5, %v431_v1  ;;  %869 = vst [vmem:[#allocation8 + $0x10] sm:$0xff] %v431_v1 }
 0x346   :  { %v434_v3 = vmul.f32 1.442695, %v433_v2 }
 0x348   :  { %1078 = vpow2.f32 %v434_v3 }
 0x355   :  { %v1079_v5 = vpop.eup %1078 }
 0x356   :  { %v436_v6 = vmul.f32 %v1079_v5, %v83_v4 }
 0x358   :  { %v437_v7 = vadd.f32 %v436_v6, %v429_v62 }
 0x35a   :  { %1033 = vmatmul.mubr.f32.vlgmr.msra.gmra.mxu1 %v437_v7 }
 0x41a   :  { %v598_v14 = vpop.f32.mrf.mxu1 }
 0x41b   :  { %v599_v16 = vadd.f32 %v598_v14, %v528_v8 }
 0x41c   :  { %v1034_v17 = vpop.f32.mrf.mxu1 }
 0x41d   :  { %v607_v18 = vadd.f32 %v900_v15, %v599_v16 }
 0x41f   :  { %v608_v19 = vmax.f32 %v607_v18, 0.0 }
 0x421   :  { %1044 = vmatmul.mubr.msk.f32.vlgmr.msra.gmra.mxu0 %vm180_vm3, %v608_v19 }
 0x422   :  { %1047 = vmatpush3.msra.mxu0 %v910_v20  ;;  %1054 = vmatprep.mubr.msk.f32.mxu0 %vm1178_vm0, %v1177_v0 }
 0x423   :  { %1048 = vmatprep.subr.mxu0 %v1177_v0 }
 0x424   :  { %1049 = vmatpush3.msra.mxu0 %v909_v21 }
 0x425   :  { %1050 = vmatprep.subr.mxu0 %v1177_v0 }
 0x426   :  { %1051 = vmatpush3.msra.mxu0 %v908_v22 }
 0x427   :  { %1052 = vmatprep.subr.mxu0 %v1177_v0 }
 0x428   :  { %1053 = vmatpush3.msra.mxu0 %v907_v23 }
 0x429   :  { %1057 = vmatprep.subr.mxu0 %v1177_v0 }
 0x4e1   :  { %v688_v25 = vpop.f32.mrf.mxu0 }
 0x4e2   :  { %v689_v26 = vadd.f32 %v905_v24, %v688_v25 }
 0x4e3   :  { %v1045_v27 = vpop.f32.mrf.mxu0 }
 0x4e4   :  { %v692_v28 = vmax.f32 %v689_v26, 0.0 }
 0x4e6   :  { %1055 = vmatmul.mubr.msk.f32.vlgmr.msra.gmra.mxu0 %vm180_vm3, %v692_v28 }
 0x4e7   :  { %1058 = vmatpush3.msra.mxu0 %v780_v29  ;;  %1065 = vmatprep.mubr.msk.f32.mxu0 %vm1178_vm0, %v1177_v0 }
 0x4e8   :  { %1059 = vmatprep.subr.mxu0 %v1177_v0 }
 0x4e9   :  { %1060 = vmatpush3.msra.mxu0 %v779_v30 }
 0x4ea   :  { %1061 = vmatprep.subr.mxu0 %v1177_v0 }
 0x4eb   :  { %1062 = vmatpush3.msra.mxu0 %v778_v31 }
 0x4ec   :  { %1063 = vmatprep.subr.mxu0 %v1177_v0 }
 0x4ed   :  { %1064 = vmatpush3.msra.mxu0 %v777_v32 }
 0x5a6   :  { %v772_v34 = vpop.f32.mrf.mxu0 }
 0x5a7   :  { %v773_v35 = vadd.f32 %v911_v33, %v772_v34 }
 0x5a8   :  { %v1056_v36 = vpop.f32.mrf.mxu0 }
 0x5a9   :  { %v776_v37 = vmax.f32 %v773_v35, 0.0 }
 0x5ab   :  { %1066 = vmatmul.mubr.msk.f32.vlgmr.msra.gmra.mxu0 %vm180_vm3, %v776_v37 }
 0x66b   :  { %v857_v0 = vpop.f32.mrf.mxu0 }
 0x66c   :  { %v858_v39 = vadd.f32 %v913_v38, %v857_v0 }
 0x66d   :  { %v1067_v40 = vpop.f32.mrf.mxu0 }
 0x66e   :  { %v915_v41 = vmul.f32 -1.442695, %v858_v39 }
 0x670   :  { %1080 = vpow2.f32 %v915_v41 }
 0x67d   :  { %v1081_v42 = vpop.eup %1080 }
 0x67e   :  { %v864_v43 = vadd.f32 1.0, %v1081_v42 }
 0x680   :  { %1082 = vrcp.f32 %v864_v43 }
 0x68d   :  { %v1083_v44 = vpop.eup %1082 }
 0x68e   :  { %867 = vst [vmem:[#allocation8] sm:$0xff] %v1083_v44 }
 0x68f   :  { %1155 = shalt.err (!%p1152_p5)
}
 0x690   :  { %879 = dma.vmem_to_hbm [thread:$0]  %s877_s9, 384, %s1475_s12, [#allocation4]  }
 0x691   :  { %1168 = dma.done.wait [#allocation4], 384  }
 0x692   :  { %1169 = vsyncadd [#allocation4], 4294966912 }
 0x693   :  { %883 = vsyncpa [#allocation3], 1 }
 0x694   :  { %884 = vsyncpa [#allocation6], 1 }
 0x695   :  { %885 = vsyncpa [#allocation4], 1 }

</bundles_post_ra>
